<compile_context>
chip_gen: v7x
topology: tpu7x:2x2x1
jax: 0.10.0
libtpu: 0.0.40
codegen_flags: <defaults>
</compile_context>

<pallas_src>
import jax
import jax.numpy as jnp
from jax import lax
from jax.experimental import pallas as pl
from jax.experimental.pallas import tpu as pltpu


# ----------------------------------------------------------------------------
# XLA-side glue: bilinear 2x upsample (align_corners=False, PyTorch semantics),
# gather-free (even/odd slice + lerp + interleave).
# ----------------------------------------------------------------------------
def upsample2x_bilinear_nchw(x: jnp.ndarray) -> jnp.ndarray:
    def up_axis(a, axis):
        L = a.shape[axis]
        first = lax.slice_in_dim(a, 0, 1, axis=axis)
        last = lax.slice_in_dim(a, L - 1, L, axis=axis)
        prev = jnp.concatenate([first, lax.slice_in_dim(a, 0, L - 1, axis=axis)], axis=axis)
        nxt = jnp.concatenate([lax.slice_in_dim(a, 1, L, axis=axis), last], axis=axis)
        # out[2k]   = 0.75*a[k] + 0.25*a[max(k-1, 0)]   (src = k - 0.25, clamped)
        # out[2k+1] = 0.75*a[k] + 0.25*a[min(k+1, L-1)] (src = k + 0.25, clamped)
        even = 0.75 * a + 0.25 * prev
        odd = 0.75 * a + 0.25 * nxt
        out = jnp.stack([even, odd], axis=axis + 1)
        shape = list(a.shape)
        shape[axis] = 2 * L
        return out.reshape(shape)

    return up_axis(up_axis(x, 2), 3)


# ----------------------------------------------------------------------------
# Row-tile selection: lane-dense (Tr*W2 % 128 == 0), VMEM-bounded (v7x 64 MiB),
# and >= 4 row steps per image when possible so the pipeline can overlap DMA.
# ----------------------------------------------------------------------------
def _pick_row_tile(H2: int, W2: int, C: int) -> int:
    budget_bytes = 2 * 1024 * 1024  # main activation block per grid step
    cands = [t for t in range(1, H2 + 1) if H2 % t == 0 and (t * W2) % 128 == 0]
    if not cands:
        return H2  # full-extent block is always (8,128)-legal
    for min_steps in (4, 2, 1):
        ok = [t for t in cands
              if H2 // t >= min_steps and C * t * W2 * 4 <= budget_bytes]
        if ok:
            return max(ok)
    return min(cands)


# ----------------------------------------------------------------------------
# Pallas kernel: fused 3x3 conv (zero pad folded in) + bias + sigmoid.
# One grid step = (batch n, row-tile i); all spatial dims are lane-flattened.
# ----------------------------------------------------------------------------
def _fused_conv3x3_sigmoid_kernel(up_ref, halo_ref, w_ref, b_ref,
                                  heat_ref, edge_ref):
    # up_ref   : (1, C, S)          S = Tr*W2, rows of this tile, lane-flattened
    # halo_ref : (1, 1, 2C, W2)     [0:C] row above the tile, [C:2C] row below
    #                               (zeros at the image border == conv zero pad)
    # w_ref    : (9, 5, C)          w[dh*3+dw, o, c] = conv weight
    # b_ref    : (5, 1)             fused biases
    # heat_ref : (1, 4, S)          lane-dense output tile
    # edge_ref : (1, 1, S)
    C = up_ref.shape[1]
    S = up_ref.shape[2]
    W2 = halo_ref.shape[3]
    n_heat = heat_ref.shape[1]

    main = up_ref[0]                      # (C, S)
    halo = halo_ref[0, 0]                 # (2C, W2)
    prev = halo[:C]                       # (C, W2)  row tile_start-1 (or zeros)
    nxt = halo[C:]                        # (C, W2)  row tile_start+Tr (or zeros)

    # Haloed slab: columns = [prev | tile rows | next], each row W2 wide.
    hal = jnp.concatenate([prev, main, nxt], axis=1)      # (C, S + 2*W2)

    # Hoisted row-boundary masks (the conv's left/right zero padding) and the
    # single-lane zero column used by the +-1 lane shifts.
    col = jax.lax.broadcasted_iota(jnp.int32, (C, S), 1) % W2
    m_first = (col != 0).astype(jnp.float32)              # kills wrap at col 0
    m_last = (col != (W2 - 1)).astype(jnp.float32)        # kills wrap at col W2-1
    zcol = jnp.zeros((C, 1), jnp.float32)

    acc = jnp.zeros((5, S), jnp.float32)
    for dh in range(3):
        # Row-shifted slab for this dh, shared by all C channels and all 5
        # output channels (one static lane slice, no per-channel copies).
        slab = hal[:, dh * W2: dh * W2 + S]                # (C, S)
        taps = (
            jnp.concatenate([zcol, slab[:, :-1]], axis=1) * m_first,  # dw=0 -> col j-1
            slab,                                                      # dw=1 -> col j
            jnp.concatenate([slab[:, 1:], zcol], axis=1) * m_last,    # dw=2 -> col j+1
        )
        for dw in range(3):
            # MXU: (5, C) x (C, S) accumulated in f32.
            acc = acc + jnp.dot(w_ref[dh * 3 + dw], taps[dw],
                                preferred_element_type=jnp.float32)

    out = jax.nn.sigmoid(acc + b_ref[...])                 # (5, S)
    heat_ref[0] = out[:n_heat]
    edge_ref[0] = out[n_heat:n_heat + 1]


def _fused_head_pallas(up_flat, halos, w_taps, b2, *, N, C, H2, W2, Tr):
    n_tiles = H2 // Tr
    S = Tr * W2
    heat, edge = pl.pallas_call(
        _fused_conv3x3_sigmoid_kernel,
        out_shape=(
            jax.ShapeDtypeStruct((N, 4, H2 * W2), jnp.float32),
            jax.ShapeDtypeStruct((N, 1, H2 * W2), jnp.float32),
        ),
        grid=(N, n_tiles),
        in_specs=[
            pl.BlockSpec((1, C, S), lambda n, i: (n, 0, i)),
            pl.BlockSpec((1, 1, 2 * C, W2), lambda n, i: (n, i, 0, 0)),
            pl.BlockSpec((9, 5, C), lambda n, i: (0, 0, 0)),
            pl.BlockSpec((5, 1), lambda n, i: (0, 0)),
        ],
        out_specs=[
            pl.BlockSpec((1, 4, S), lambda n, i: (n, 0, i)),
            pl.BlockSpec((1, 1, S), lambda n, i: (n, 0, i)),
        ],
        compiler_params=pltpu.CompilerParams(
            dimension_semantics=("parallel", "parallel"),  # batch & row tiles
            vmem_limit_bytes=48 * 1024 * 1024,             # < v7x's 64 MiB
        ),
    )(up_flat, halos, w_taps, b2)
    return heat, edge


# ----------------------------------------------------------------------------
# Module wrapper
# ----------------------------------------------------------------------------
def heatmap_edge_reg_up2_head(x: jnp.ndarray,
                              w_heat: jnp.ndarray, b_heat: jnp.ndarray,
                              w_edge: jnp.ndarray, b_edge: jnp.ndarray):
    """x: (N, in_c, H, W) float32. Returns (heatmap (N,4,2H,2W), edge (N,2H,2W))."""
    N, C, H, W = x.shape
    H2, W2 = 2 * H, 2 * W

    up4 = upsample2x_bilinear_nchw(x)                      # (N, C, H2, W2)
    Tr = _pick_row_tile(H2, W2, C)
    n_tiles = H2 // Tr

    # Main activation, lane-flattened (free reshape, contiguous).
    up_flat = up4.reshape(N, C, H2 * W2)

    # Per-tile halo rows: row above / row below each row tile; zeros at the
    # image border so the folded conv zero-padding stays exact.
    zrow = jnp.zeros((N, C, 1, W2), up4.dtype)
    prev_rows = jnp.concatenate([zrow, up4[:, :, Tr - 1:H2 - 1:Tr, :]], axis=2)
    next_rows = jnp.concatenate([up4[:, :, Tr:H2:Tr, :], zrow], axis=2)
    halos = jnp.concatenate([prev_rows, next_rows], axis=1)   # (N, 2C, n_tiles, W2)
    halos = jnp.transpose(halos, (0, 2, 1, 3))                # (N, n_tiles, 2C, W2)

    # Fuse both conv branches into one 5-channel conv; weights per (dh, dw) tap.
    w = jnp.concatenate([w_heat, w_edge], axis=0)             # (5, C, 3, 3)
    b = jnp.concatenate([b_heat, b_edge], axis=0)             # (5,)
    w_taps = jnp.transpose(w, (2, 3, 0, 1)).reshape(9, 5, C)  # [dh*3+dw, o, c]
    b2 = b.reshape(5, 1)

    heat_flat, edge_flat = _fused_head_pallas(
        up_flat, halos, w_taps, b2, N=N, C=C, H2=H2, W2=W2, Tr=Tr)

    heatmap = heat_flat.reshape(N, 4, H2, W2)
    edge = edge_flat.reshape(N, H2, W2)
    return heatmap, edge


# ----------------------------------------------------------------------------
# Pure-JAX reference (sanity check)
# ----------------------------------------------------------------------------
def _reference(x, w_heat, b_heat, w_edge, b_edge):
    up = upsample2x_bilinear_nchw(x)

    def conv(w, b):
        y = lax.conv_general_dilated(
            up, w, window_strides=(1, 1), padding="SAME",
            dimension_numbers=("NCHW", "OIHW", "NCHW"))
        return jax.nn.sigmoid(y + b[None, :, None, None])

    heat = conv(w_heat, b_heat)
    edge = conv(w_edge, b_edge)[:, 0]
    return heat, edge


if __name__ == "__main__":
    N, in_c, H, W = 2, 4, 16, 16

    key = jax.random.PRNGKey(0)
    kx, kwh, kbh, kwe, kbe = jax.random.split(key, 5)

    x = jax.random.normal(kx, (N, in_c, H, W), dtype=jnp.float32)

    # Parameter shapes match nn.Conv2d(in_c, 4/1, 3, padding=1).
    fan_in = in_c * 9
    scale = 1.0 / jnp.sqrt(jnp.float32(fan_in))
    w_heat = jax.random.uniform(kwh, (4, in_c, 3, 3), jnp.float32, -scale, scale)
    b_heat = jax.random.uniform(kbh, (4,), jnp.float32, -scale, scale)
    w_edge = jax.random.uniform(kwe, (1, in_c, 3, 3), jnp.float32, -scale, scale)
    b_edge = jax.random.uniform(kbe, (1,), jnp.float32, -scale, scale)

    heatmap, edge = jax.jit(heatmap_edge_reg_up2_head)(x, w_heat, b_heat, w_edge, b_edge)
    jax.block_until_ready((heatmap, edge))

    assert heatmap.shape == (N, 4, 2 * H, 2 * W), heatmap.shape
    assert edge.shape == (N, 2 * H, 2 * W), edge.shape

    heat_ref, edge_ref = _reference(x, w_heat, b_heat, w_edge, b_edge)
    # Tolerance accounts for the MXU's default f32 matmul precision (bf16
    # passes) in the kernel and the XLA conv's own default precision in the
    # reference; structural bugs (wrong taps/halos/masks) produce O(1e-2+)
    # elementwise errors and are still caught.
    assert jnp.allclose(heatmap, heat_ref, atol=5e-3, rtol=5e-3)
    assert jnp.allclose(edge, edge_ref, atol=5e-3, rtol=5e-3)

    print("KERNEL_OK")
</pallas_src>

<mosaic_0001>
module attributes {stable_mosaic.version = 11 : i64} {
  func.func @_fused_conv3x3_sigmoid_kernel(%arg0: i32, %arg1: i32, %arg2: memref<1x4x256xf32, #tpu.memory_space<vmem>>, %arg3: memref<1x1x8x32xf32, #tpu.memory_space<vmem>>, %arg4: memref<9x5x4xf32, #tpu.memory_space<vmem>>, %arg5: memref<5x1xf32, #tpu.memory_space<vmem>>, %arg6: memref<1x4x256xf32, #tpu.memory_space<vmem>>, %arg7: memref<1x1x256xf32, #tpu.memory_space<vmem>>) attributes {dimension_semantics = [#tpu.dimension_semantics<parallel>, #tpu.dimension_semantics<parallel>], iteration_bounds = array<i64: 2, 4>, scalar_prefetch = 0 : i64, scratch_operands = 0 : i64, tpu.core_type = #tpu.core_type<tc>, window_params = [{transform_indices = @transform_0, window_bounds = array<i64: 1, 4, 256>}, {transform_indices = @transform_1, window_bounds = array<i64: 1, 1, 8, 32>}, {pipeline_mode = #tpu.pipeline_mode<synchronous>, transform_indices = @transform_2, window_bounds = array<i64: 9, 5, 4>}, {pipeline_mode = #tpu.pipeline_mode<synchronous>, transform_indices = @transform_3, window_bounds = array<i64: 5, 1>}, {transform_indices = @transform_4, window_bounds = array<i64: 1, 4, 256>}, {transform_indices = @transform_5, window_bounds = array<i64: 1, 1, 256>}]} {
    %c0 = arith.constant 0 : index
    %c0_0 = arith.constant 0 : index
    %c0_1 = arith.constant 0 : index
    %0 = vector.load %arg2[%c0, %c0_0, %c0_1] : memref<1x4x256xf32, #tpu.memory_space<vmem>>, vector<1x4x256xf32>
    %1 = vector.shape_cast %0 : vector<1x4x256xf32> to vector<4x256xf32>
    %c0_2 = arith.constant 0 : index
    %c0_3 = arith.constant 0 : index
    %c0_4 = arith.constant 0 : index
    %c0_5 = arith.constant 0 : index
    %2 = vector.load %arg3[%c0_2, %c0_3, %c0_4, %c0_5] : memref<1x1x8x32xf32, #tpu.memory_space<vmem>>, vector<1x1x8x32xf32>
    %3 = vector.shape_cast %2 : vector<1x1x8x32xf32> to vector<8x32xf32>
    %4 = vector.extract_strided_slice %3 {offsets = [0, 0], sizes = [4, 32], strides = [1, 1]} : vector<8x32xf32> to vector<4x32xf32>
    %5 = vector.extract_strided_slice %3 {offsets = [4, 0], sizes = [4, 32], strides = [1, 1]} : vector<8x32xf32> to vector<4x32xf32>
    %6 = tpu.concatenate %4, %1, %5 in 1 : vector<4x32xf32>, vector<4x256xf32>, vector<4x32xf32> -> vector<4x320xf32>
    %7 = tpu.iota {dimensions = array<i32: 1>} : vector<4x256xi32>
    %c32_i32 = arith.constant 32 : i32
    %c0_i32 = arith.constant 0 : i32
    %8 = arith.cmpi eq, %c32_i32, %c0_i32 : i32
    %c1_i32 = arith.constant 1 : i32
    %9 = arith.select %8, %c1_i32, %c32_i32 : i32
    %10 = vector.broadcast %9 : i32 to vector<4x256xi32>
    %11 = arith.remsi %7, %10 : vector<4x256xi32>
    %c0_i32_6 = arith.constant 0 : i32
    %12 = vector.broadcast %c0_i32_6 : i32 to vector<4x256xi32>
    %13 = arith.cmpi ne, %11, %12 : vector<4x256xi32>
    %c0_i32_7 = arith.constant 0 : i32
    %14 = vector.broadcast %c0_i32_7 : i32 to vector<4x256xi32>
    %15 = arith.cmpi slt, %11, %14 : vector<4x256xi32>
    %c0_i32_8 = arith.constant 0 : i32
    %16 = arith.cmpi slt, %9, %c0_i32_8 : i32
    %17 = vector.broadcast %16 : i1 to vector<4x256xi1>
    %18 = vector.broadcast %17 : vector<4x256xi1> to vector<4x256xi1>
    %19 = arith.xori %15, %18 : vector<4x256xi1>
    %20 = arith.andi %19, %13 : vector<4x256xi1>
    %21 = vector.broadcast %9 : i32 to vector<4x256xi32>
    %22 = arith.addi %11, %21 : vector<4x256xi32>
    %23 = arith.select %20, %22, %11 : vector<4x256xi1>, vector<4x256xi32>
    %c0_i32_9 = arith.constant 0 : i32
    %24 = vector.broadcast %c0_i32_9 : i32 to vector<4x256xi32>
    %25 = arith.cmpi ne, %23, %24 : vector<4x256xi32>
    %26 = arith.extui %25 : vector<4x256xi1> to vector<4x256xi32>
    %27 = arith.sitofp %26 : vector<4x256xi32> to vector<4x256xf32>
    %c31_i32 = arith.constant 31 : i32
    %28 = vector.broadcast %c31_i32 : i32 to vector<4x256xi32>
    %29 = arith.cmpi ne, %23, %28 : vector<4x256xi32>
    %30 = arith.extui %29 : vector<4x256xi1> to vector<4x256xi32>
    %31 = arith.sitofp %30 : vector<4x256xi32> to vector<4x256xf32>
    %cst = arith.constant 0.000000e+00 : f32
    %32 = vector.broadcast %cst : f32 to vector<4x1xf32>
    %cst_10 = arith.constant 0.000000e+00 : f32
    %33 = vector.broadcast %cst_10 : f32 to vector<5x256xf32>
    %34 = vector.extract_strided_slice %6 {offsets = [0, 0], sizes = [4, 256], strides = [1, 1]} : vector<4x320xf32> to vector<4x256xf32>
    %35 = vector.extract_strided_slice %34 {offsets = [0, 0], sizes = [4, 255], strides = [1, 1]} : vector<4x256xf32> to vector<4x255xf32>
    %36 = tpu.concatenate %32, %35 in 1 : vector<4x1xf32>, vector<4x255xf32> -> vector<4x256xf32>
    %37 = arith.mulf %36, %27 : vector<4x256xf32>
    %38 = vector.extract_strided_slice %34 {offsets = [0, 1], sizes = [4, 255], strides = [1, 1]} : vector<4x256xf32> to vector<4x255xf32>
    %39 = tpu.concatenate %38, %32 in 1 : vector<4x255xf32>, vector<4x1xf32> -> vector<4x256xf32>
    %40 = arith.mulf %39, %31 : vector<4x256xf32>
    %c0_11 = arith.constant 0 : index
    %c0_12 = arith.constant 0 : index
    %c0_13 = arith.constant 0 : index
    %41 = vector.load %arg4[%c0_11, %c0_12, %c0_13] : memref<9x5x4xf32, #tpu.memory_space<vmem>>, vector<1x5x4xf32>
    %42 = vector.shape_cast %41 : vector<1x5x4xf32> to vector<5x4xf32>
    %cst_14 = arith.constant dense<0.000000e+00> : vector<5x256xf32>
    %43 = tpu.matmul %42, %37, %cst_14 {dimension_numbers = #tpu.dot_dimension_numbers<[1], [0], [0], [1], [0, 0, 1, 1], [], []>} : vector<5x4xf32>, vector<4x256xf32>, vector<5x256xf32> -> vector<5x256xf32>
    %44 = arith.addf %33, %43 : vector<5x256xf32>
    %c1 = arith.constant 1 : index
    %c0_15 = arith.constant 0 : index
    %c0_16 = arith.constant 0 : index
    %45 = vector.load %arg4[%c1, %c0_15, %c0_16] : memref<9x5x4xf32, #tpu.memory_space<vmem>>, vector<1x5x4xf32>
    %46 = vector.shape_cast %45 : vector<1x5x4xf32> to vector<5x4xf32>
    %cst_17 = arith.constant dense<0.000000e+00> : vector<5x256xf32>
    %47 = tpu.matmul %46, %34, %cst_17 {dimension_numbers = #tpu.dot_dimension_numbers<[1], [0], [0], [1], [0, 0, 1, 1], [], []>} : vector<5x4xf32>, vector<4x256xf32>, vector<5x256xf32> -> vector<5x256xf32>
    %48 = arith.addf %44, %47 : vector<5x256xf32>
    %c2 = arith.constant 2 : index
    %c0_18 = arith.constant 0 : index
    %c0_19 = arith.constant 0 : index
    %49 = vector.load %arg4[%c2, %c0_18, %c0_19] : memref<9x5x4xf32, #tpu.memory_space<vmem>>, vector<1x5x4xf32>
    %50 = vector.shape_cast %49 : vector<1x5x4xf32> to vector<5x4xf32>
    %cst_20 = arith.constant dense<0.000000e+00> : vector<5x256xf32>
    %51 = tpu.matmul %50, %40, %cst_20 {dimension_numbers = #tpu.dot_dimension_numbers<[1], [0], [0], [1], [0, 0, 1, 1], [], []>} : vector<5x4xf32>, vector<4x256xf32>, vector<5x256xf32> -> vector<5x256xf32>
    %52 = arith.addf %48, %51 : vector<5x256xf32>
    %53 = vector.extract_strided_slice %6 {offsets = [0, 32], sizes = [4, 256], strides = [1, 1]} : vector<4x320xf32> to vector<4x256xf32>
    %54 = vector.extract_strided_slice %53 {offsets = [0, 0], sizes = [4, 255], strides = [1, 1]} : vector<4x256xf32> to vector<4x255xf32>
    %55 = tpu.concatenate %32, %54 in 1 : vector<4x1xf32>, vector<4x255xf32> -> vector<4x256xf32>
    %56 = arith.mulf %55, %27 : vector<4x256xf32>
    %57 = vector.extract_strided_slice %53 {offsets = [0, 1], sizes = [4, 255], strides = [1, 1]} : vector<4x256xf32> to vector<4x255xf32>
    %58 = tpu.concatenate %57, %32 in 1 : vector<4x255xf32>, vector<4x1xf32> -> vector<4x256xf32>
    %59 = arith.mulf %58, %31 : vector<4x256xf32>
    %c3 = arith.constant 3 : index
    %c0_21 = arith.constant 0 : index
    %c0_22 = arith.constant 0 : index
    %60 = vector.load %arg4[%c3, %c0_21, %c0_22] : memref<9x5x4xf32, #tpu.memory_space<vmem>>, vector<1x5x4xf32>
    %61 = vector.shape_cast %60 : vector<1x5x4xf32> to vector<5x4xf32>
    %cst_23 = arith.constant dense<0.000000e+00> : vector<5x256xf32>
    %62 = tpu.matmul %61, %56, %cst_23 {dimension_numbers = #tpu.dot_dimension_numbers<[1], [0], [0], [1], [0, 0, 1, 1], [], []>} : vector<5x4xf32>, vector<4x256xf32>, vector<5x256xf32> -> vector<5x256xf32>
    %63 = arith.addf %52, %62 : vector<5x256xf32>
    %c4 = arith.constant 4 : index
    %c0_24 = arith.constant 0 : index
    %c0_25 = arith.constant 0 : index
    %64 = vector.load %arg4[%c4, %c0_24, %c0_25] : memref<9x5x4xf32, #tpu.memory_space<vmem>>, vector<1x5x4xf32>
    %65 = vector.shape_cast %64 : vector<1x5x4xf32> to vector<5x4xf32>
    %cst_26 = arith.constant dense<0.000000e+00> : vector<5x256xf32>
    %66 = tpu.matmul %65, %53, %cst_26 {dimension_numbers = #tpu.dot_dimension_numbers<[1], [0], [0], [1], [0, 0, 1, 1], [], []>} : vector<5x4xf32>, vector<4x256xf32>, vector<5x256xf32> -> vector<5x256xf32>
    %67 = arith.addf %63, %66 : vector<5x256xf32>
    %c5 = arith.constant 5 : index
    %c0_27 = arith.constant 0 : index
    %c0_28 = arith.constant 0 : index
    %68 = vector.load %arg4[%c5, %c0_27, %c0_28] : memref<9x5x4xf32, #tpu.memory_space<vmem>>, vector<1x5x4xf32>
    %69 = vector.shape_cast %68 : vector<1x5x4xf32> to vector<5x4xf32>
    %cst_29 = arith.constant dense<0.000000e+00> : vector<5x256xf32>
    %70 = tpu.matmul %69, %59, %cst_29 {dimension_numbers = #tpu.dot_dimension_numbers<[1], [0], [0], [1], [0, 0, 1, 1], [], []>} : vector<5x4xf32>, vector<4x256xf32>, vector<5x256xf32> -> vector<5x256xf32>
    %71 = arith.addf %67, %70 : vector<5x256xf32>
    %72 = vector.extract_strided_slice %6 {offsets = [0, 64], sizes = [4, 256], strides = [1, 1]} : vector<4x320xf32> to vector<4x256xf32>
    %73 = vector.extract_strided_slice %72 {offsets = [0, 0], sizes = [4, 255], strides = [1, 1]} : vector<4x256xf32> to vector<4x255xf32>
    %74 = tpu.concatenate %32, %73 in 1 : vector<4x1xf32>, vector<4x255xf32> -> vector<4x256xf32>
    %75 = arith.mulf %74, %27 : vector<4x256xf32>
    %76 = vector.extract_strided_slice %72 {offsets = [0, 1], sizes = [4, 255], strides = [1, 1]} : vector<4x256xf32> to vector<4x255xf32>
    %77 = tpu.concatenate %76, %32 in 1 : vector<4x255xf32>, vector<4x1xf32> -> vector<4x256xf32>
    %78 = arith.mulf %77, %31 : vector<4x256xf32>
    %c6 = arith.constant 6 : index
    %c0_30 = arith.constant 0 : index
    %c0_31 = arith.constant 0 : index
    %79 = vector.load %arg4[%c6, %c0_30, %c0_31] : memref<9x5x4xf32, #tpu.memory_space<vmem>>, vector<1x5x4xf32>
    %80 = vector.shape_cast %79 : vector<1x5x4xf32> to vector<5x4xf32>
    %cst_32 = arith.constant dense<0.000000e+00> : vector<5x256xf32>
    %81 = tpu.matmul %80, %75, %cst_32 {dimension_numbers = #tpu.dot_dimension_numbers<[1], [0], [0], [1], [0, 0, 1, 1], [], []>} : vector<5x4xf32>, vector<4x256xf32>, vector<5x256xf32> -> vector<5x256xf32>
    %82 = arith.addf %71, %81 : vector<5x256xf32>
    %c7 = arith.constant 7 : index
    %c0_33 = arith.constant 0 : index
    %c0_34 = arith.constant 0 : index
    %83 = vector.load %arg4[%c7, %c0_33, %c0_34] : memref<9x5x4xf32, #tpu.memory_space<vmem>>, vector<1x5x4xf32>
    %84 = vector.shape_cast %83 : vector<1x5x4xf32> to vector<5x4xf32>
    %cst_35 = arith.constant dense<0.000000e+00> : vector<5x256xf32>
    %85 = tpu.matmul %84, %72, %cst_35 {dimension_numbers = #tpu.dot_dimension_numbers<[1], [0], [0], [1], [0, 0, 1, 1], [], []>} : vector<5x4xf32>, vector<4x256xf32>, vector<5x256xf32> -> vector<5x256xf32>
    %86 = arith.addf %82, %85 : vector<5x256xf32>
    %c8 = arith.constant 8 : index
    %c0_36 = arith.constant 0 : index
    %c0_37 = arith.constant 0 : index
    %87 = vector.load %arg4[%c8, %c0_36, %c0_37] : memref<9x5x4xf32, #tpu.memory_space<vmem>>, vector<1x5x4xf32>
    %88 = vector.shape_cast %87 : vector<1x5x4xf32> to vector<5x4xf32>
    %cst_38 = arith.constant dense<0.000000e+00> : vector<5x256xf32>
    %89 = tpu.matmul %88, %78, %cst_38 {dimension_numbers = #tpu.dot_dimension_numbers<[1], [0], [0], [1], [0, 0, 1, 1], [], []>} : vector<5x4xf32>, vector<4x256xf32>, vector<5x256xf32> -> vector<5x256xf32>
    %90 = arith.addf %86, %89 : vector<5x256xf32>
    %c0_39 = arith.constant 0 : index
    %c0_40 = arith.constant 0 : index
    %91 = vector.load %arg5[%c0_39, %c0_40] : memref<5x1xf32, #tpu.memory_space<vmem>>, vector<5x1xf32>
    %92 = vector.broadcast %91 : vector<5x1xf32> to vector<5x256xf32>
    %93 = arith.addf %90, %92 : vector<5x256xf32>
    %94 = arith.negf %93 : vector<5x256xf32>
    %95 = math.exp %94 : vector<5x256xf32>
    %cst_41 = arith.constant 1.000000e+00 : f32
    %96 = vector.broadcast %cst_41 : f32 to vector<5x256xf32>
    %97 = arith.addf %96, %95 : vector<5x256xf32>
    %98 = arith.divf %96, %97 : vector<5x256xf32>
    %99 = vector.extract_strided_slice %98 {offsets = [0, 0], sizes = [4, 256], strides = [1, 1]} : vector<5x256xf32> to vector<4x256xf32>
    %c0_42 = arith.constant 0 : index
    %c0_43 = arith.constant 0 : index
    %c0_44 = arith.constant 0 : index
    %100 = vector.load %arg6[%c0_42, %c0_43, %c0_44] : memref<1x4x256xf32, #tpu.memory_space<vmem>>, vector<1x4x256xf32>
    %101 = vector.shape_cast %100 : vector<1x4x256xf32> to vector<4x256xf32>
    %102 = vector.shape_cast %99 : vector<4x256xf32> to vector<1x4x256xf32>
    tpu.vector_store %arg6[%c0_42, %c0_43, %c0_44], %102 {strides = array<i32>} : memref<1x4x256xf32, #tpu.memory_space<vmem>>, vector<1x4x256xf32>,
    %103 = vector.extract_strided_slice %98 {offsets = [4, 0], sizes = [1, 256], strides = [1, 1]} : vector<5x256xf32> to vector<1x256xf32>
    %c0_45 = arith.constant 0 : index
    %c0_46 = arith.constant 0 : index
    %c0_47 = arith.constant 0 : index
    %104 = vector.load %arg7[%c0_45, %c0_46, %c0_47] : memref<1x1x256xf32, #tpu.memory_space<vmem>>, vector<1x1x256xf32>
    %105 = vector.shape_cast %104 : vector<1x1x256xf32> to vector<1x256xf32>
    %106 = vector.shape_cast %103 : vector<1x256xf32> to vector<1x1x256xf32>
    tpu.vector_store %arg7[%c0_45, %c0_46, %c0_47], %106 {strides = array<i32>} : memref<1x1x256xf32, #tpu.memory_space<vmem>>, vector<1x1x256xf32>,
    return
  }
  func.func @transform_0(%arg0: i32, %arg1: i32) -> (i32, i32, i32) {
    %c0_i32 = arith.constant 0 : i32
    %c0_i32_0 = arith.constant 0 : i32
    return %arg0, %c0_i32, %arg1 : i32, i32, i32
  }
  func.func @transform_1(%arg0: i32, %arg1: i32) -> (i32, i32, i32, i32) {
    %c0_i32 = arith.constant 0 : i32
    %c0_i32_0 = arith.constant 0 : i32
    %c0_i32_1 = arith.constant 0 : i32
    return %arg0, %arg1, %c0_i32, %c0_i32_0 : i32, i32, i32, i32
  }
  func.func @transform_2(%arg0: i32, %arg1: i32) -> (i32, i32, i32) {
    %c0_i32 = arith.constant 0 : i32
    %c0_i32_0 = arith.constant 0 : i32
    %c0_i32_1 = arith.constant 0 : i32
    %c0_i32_2 = arith.constant 0 : i32
    return %c0_i32, %c0_i32_0, %c0_i32_1 : i32, i32, i32
  }
  func.func @transform_3(%arg0: i32, %arg1: i32) -> (i32, i32) {
    %c0_i32 = arith.constant 0 : i32
    %c0_i32_0 = arith.constant 0 : i32
    %c0_i32_1 = arith.constant 0 : i32
    return %c0_i32, %c0_i32_0 : i32, i32
  }
  func.func @transform_4(%arg0: i32, %arg1: i32) -> (i32, i32, i32) {
    %c0_i32 = arith.constant 0 : i32
    %c0_i32_0 = arith.constant 0 : i32
    return %arg0, %c0_i32, %arg1 : i32, i32, i32
  }
  func.func @transform_5(%arg0: i32, %arg1: i32) -> (i32, i32, i32) {
    %c0_i32 = arith.constant 0 : i32
    %c0_i32_0 = arith.constant 0 : i32
    return %arg0, %c0_i32, %arg1 : i32, i32, i32
  }
}

</mosaic_0001>

<bundles_post_ra>
// kernel: heatmap_edge_reg_up2_head.1
= control target key start
LH: loop header
LB: loop body
LE: loop exit
PB: predicated region body
PF: predicated region fallthrough
CT: control target
= control target key end

     0   :  { %s1637_s18 = smov 0   ;;  %s1639_s19 = smov 0   ;;  %s1800_s0 = inlined_call_operand.vmem [shape: f32[2,4,1024], index: 0, kind: input, shape index: {}]   ;;  %s1801_s1 = inlined_call_operand.vmem [shape: f32[2,4,8,32], index: 1, kind: input, shape index: {}]   ;;  %s1802_s2 = inlined_call_operand.vmem [shape: f32[9,5,4], index: 2, kind: input, shape index: {}]   ;;  %s1803_s3 = inlined_call_operand.vmem [shape: f32[5,1], index: 3, kind: input, shape index: {}]   ;;  %s1804_s4 = inlined_call_operand.vmem [shape: f32[2,4,1024], index: 4, kind: output, shape index: {0}]   ;;  %s1805_s5 = inlined_call_operand.vmem [shape: f32[2,1,1024], index: 5, kind: output, shape index: {1}]  }
   0x1   :  { %s1641_s20 = smov 0   ;;  %s1643_s21 = smov 0  }
   0x2   :  { %s1645_s22 = smov 0  }
   0x3 LB: > { %s25_s23 = sadd.s32 1, %s1585_s20  ;;  %s28_s24 = sadd.s32 1, %s1589_s21  ;;  %s1593_s22 = sphi %s1645_s22, %s16_s22   ;;  %s1589_s21 = sphi %s1643_s21, %s1809_s21   ;;  %s1585_s20 = sphi %s1641_s20, %s1808_s20   ;;  %s1581_s19 = sphi %s1639_s19, %s1807_s19   ;;  %s1577_s18 = sphi %s1637_s18, %s1806_s18  }
   0x4   : > { %p26_p0 = scmp.ge.s32.totalorder %s25_s23, 4  ;;  %p1422_p1 = scmp.ge.s32.totalorder %s1593_s22, 1 }
   0x5   : > { %p228_p2 = scmp.lt.s32.totalorder %s1593_s22, 9 }
   0x6   : > { %s1811_s23 = smov (%p26_p0, %s25_s23), 0  ;;  %s1813_s24 = smov (!%p26_p0, %s28_s24), %s1589_s21 }
   0x7   : > { %p229_p3 = pnand %p1422_p1, %p228_p2  ;;  %p30_p4 = scmp.ge.s32.totalorder %s1813_s24, 2 }
   0x8   : > { %s1423_s25 = sshll.u32 (!%p229_p3), %s1577_s18, 1  ;;  %p281_p5 = scmp.lt.s32.totalorder (!%p229_p3), %s1581_s19, 1  ;;  %v1596_v4 = vmov (!%p229_p3), 0.0   ;;  %vm325_vm0 = vcmask (!%p229_p3), 261120   ;;  %vm405_vm1 = vcmask (!%p229_p3), 1043456   ;;  %vm401_vm2 = vcmask (!%p229_p3), 31744  }
   0x9   : > { %s1815_s24 = smov (%p30_p4, %s1813_s24), 0  ;;  %232 = sbr.rel (%p229_p3) target bundleno = 548 (0x224), region = 36 }
   0xa   : > { %p283_p6 = scmp.lt.s32.totalorder (!%p229_p3), %s1423_s25, 7  ;;  %p292_p7 = scmp.lt.s32.totalorder (!%p229_p3), %s1577_s18, 3  ;;  %840 = vmatprep.mubr.f32.mxu0 (!%p229_p3), %v1596_v4  ;;  %474 = vmatprep.mubr.f32.mxu1 (!%p229_p3), %v1596_v4  ;;  %v1437_v11 = vld [vmem:[%s1802_s2 + $0x8] sm:$0x1f] (!%p229_p3)  ;;  %v1605_v12 = vmov (!%p229_p3), 0   ;;  %v336_v14 = vlaneseq (!%p229_p3)  ;;  %vm766_vm3 = vcmask (!%p229_p3), 785408  }
   0xb   : > { %s1595_s8 = smov (!%p229_p3), 32   ;;  %s1597_s14 = smov (!%p229_p3), 96   ;;  %1544 = vset.pattern.permute.xlu1 (!%p229_p3), %v1605_v12  ;;  %1545 = vset.pattern.permute.xlu0 (!%p229_p3), %v1605_v12  ;;  %v1220_v13 = vld [vmem:[%s1803_s3] sm:$0x1f] (!%p229_p3)  ;;  %vm666_vm6 = vcmask (!%p229_p3), 777216   ;;  %vm391_vm7 = vcmask (!%p229_p3), 1039360  }
   0xc   : > { %s1598_s15 = smov (!%p229_p3), 95   ;;  %s1599_s16 = smov (!%p229_p3), 1   ;;  %v337_v15 = vand.u32 (!%p229_p3), 127, %v336_v14  ;;  %v1452_v26 = vld [vmem:[%s1802_s2 + $0x20] sm:$0x1f] (!%p229_p3)  ;;  %vm380_vm10 = vcmask (!%p229_p3), 7168  }
   0xd   : > { %s1603_s29 = smov (!%p229_p3), 97   ;;  %s1604_s30 = smov (!%p229_p3), 63   ;;  %v1456_v38 = vld [vmem:[%s1802_s2 + $0x28] sm:$0x1f] (!%p229_p3)  ;;  %vm939_vm11 = vcmask (!%p229_p3), 531456   ;;  %vm1053_vm12 = vcmask (!%p229_p3), 523264  }
   0xe   : > { %v338_v18 = vadd.s32 (!%p229_p3), 128, %v337_v15  ;;  %v343_v22 = vand.u32 (!%p229_p3), 31, %v337_v15  ;;  %v398_v47 = vld [vmem:[%s1802_s2] sm:$0x1f] (!%p229_p3)  ;;  %v1460_v56 = vld [vmem:[%s1802_s2 + $0x30] sm:$0x1f] (!%p229_p3) }
   0xf   : > { %v1444_v62 = vld [vmem:[%s1802_s2 + $0x10] sm:$0x1f] (!%p229_p3)  ;;  %vm953_vm13 = vcmask (!%p229_p3), 515072   ;;  %vm652_vm14 = vcmask (!%p229_p3), 793600   ;;  %vm1263_vm15 = vcmp.lt.s32.totalorder (!%p229_p3), %v336_v14, 256 }
  0x10   : > { %s1817_s19 = smov (!%p281_p5, %s1581_s19), 1  ;;  %s1819_s25 = smov (!%p283_p6, %s1423_s25), 7  ;;  %v350_v20 = vand.u32 31, %v338_v18  ;;  %vm369_vm5 = vcmp.ne.s32.totalorder %v343_v22, 31  ;;  %vm363_vm9 = vcmp.ne.s32.totalorder %v343_v22, 0 }
  0x11   : > { %s1424_s26 = sshll.u32 %s1817_s19, 3  ;;  %s1426_s7 = sshll.u32 %s1817_s19, 2  ;;  %v1701_v30 = vsel %vm369_vm5, 1.0, %v1596_v4  ;;  %v1433_v40 = vsel %vm363_vm9, 1.0, %v1596_v4 }
  0x12   : > { %s1667_s27 = sadd.s32 %s1424_s26, %s1819_s25  ;;  %s1821_s18 = smov (!%p292_p7, %s1577_s18), 3  ;;  %vm370_vm4 = vcmp.ne.s32.totalorder %v350_v20, 31  ;;  %vm364_vm8 = vcmp.ne.s32.totalorder %v350_v20, 0 }
  0x13   : > { %s1425_s28 = sshll.u32 %s1667_s27, 2  ;;  %s295_s9 = sadd.s32 %s1426_s7, %s1821_s18  ;;  %v1697_v28 = vsel %vm370_vm4, 1.0, %v1596_v4  ;;  %v1712_v39 = vsel %vm364_vm8, 1.0, %v1596_v4 }
  0x14   : > { %s288_s6 = scalar_lea.vmem %s1800_s0, %s1425_s28  ;;  %s1427_s10 = sshll.u32 %s295_s9, 3 }
  0x15   : > { %v317_v0 = vld [vmem:[%s288_s6] sm:$0xff]  ;;  %s297_s13 = scalar_lea.vmem %s1801_s1, %s1427_s10  ;;  %s1600_s19 = smov 64  }
  0x16   : > { %321 = vrot.lane.b32.xlu0 %v317_v0, %s1595_s8  ;;  %v320_v1 = vcombine.high %v317_v0, %v317_v0  ;;  %v318_v2 = vld [vmem:[%s297_s13] sm:$0xff]  ;;  %s1601_s25 = smov 65   ;;  %s1602_s26 = smov 127  }
  0x17   : > { %v330_v3 = vrot.slane %v318_v2, 4  ;;  %s315_s11 = scalar_lea.vmem %s1805_s5, %s1667_s27 }
  0x19   : > { %331 = vrot.lane.b32.xlu1 %v330_v3, %s1595_s8 }
  0x1a   : > { %323 = vrot.lane.b32.xlu0 %v320_v1, %s1595_s8  ;;  %s306_s8 = scalar_lea.vmem %s1804_s4, %s1425_s28 }
  0x88   : > { %v322_v5 = vpop.permute.xlu0 %321 }
  0x89   : > { %v334_v6 = vsel %vm325_vm0, %v318_v2, %v322_v5 }
  0x8a   : > { %760 = vrot.lane.b32.xlu1 %v334_v6, %s1597_s14  ;;  %660 = vrot.lane.b32.xlu0 %v334_v6, %s1598_s15 }
  0x8b   : > { %v332_v9 = vpop.permute.xlu1 %331 }
  0x8c   : > { %v324_v7 = vpop.permute.xlu0 %323 }
  0x8d   : > { %v326_v8 = vsel %vm325_vm0, %v322_v5, %v324_v7  ;;  %v335_v10 = vsel %vm325_vm0, %v324_v7, %v332_v9  ;;  %v1464_v5 = vld [vmem:[%s1802_s2 + $0x38] sm:$0x1f] }
  0x8e   : > { %376 = vrot.lane.b32.xlu1 %v334_v6, %s1599_s16  ;;  %1438 = vmatprep.subr.msk.mxu1 %vm405_vm1, %v326_v8 }
  0x8f   : > { %1439 = vmatpush1.msk.msra.mxu1 %vm405_vm1, %v334_v6  ;;  %764 = vrot.lane.b32.xlu0 %v335_v10, %s1597_s14 }
  0x90   : > { %1440 = vmatmul.mubr.msk.f32.vlgmr.msra.gmra.mrb[0].mxu1 %vm401_vm2, %v1437_v11 }
  0x91   : > { %554 = vmatprep.mubr.f32.mxu1 %v1596_v4 }
  0x92   : > { %762 = vrot.lane.b32.xlu1 %v326_v8, %s1597_s14 }
  0x93   : > { %662 = vrot.lane.b32.xlu0 %v326_v8, %s1598_s15 }
  0x96   : > { %664 = vrot.lane.b32.xlu1 %v335_v10, %s1598_s15 }
  0x97   : > { %1047 = vrot.lane.b32.xlu0 %v334_v6, %s1600_s19 }
  0x9a   : > { %933 = vrot.lane.b32.xlu1 %v334_v6, %s1601_s25 }
  0x9b   : > { %378 = vrot.lane.b32.xlu0 %v326_v8, %s1599_s16 }
  0x9e   : > { %387 = vrot.lane.b32.xlu1 %v334_v6, %s1602_s26 }
  0x9f   : > { %935 = vrot.lane.b32.xlu0 %v326_v8, %s1601_s25 }
  0xa2   : > { %937 = vrot.lane.b32.xlu1 %v335_v10, %s1601_s25 }
  0xa3   : > { %389 = vrot.lane.b32.xlu0 %v326_v8, %s1602_s26 }
  0xa6   : > { %646 = vrot.lane.b32.xlu1 %v334_v6, %s1603_s29 }
  0xa7   : > { %1049 = vrot.lane.b32.xlu0 %v326_v8, %s1600_s19 }
  0xaa   : > { %1051 = vrot.lane.b32.xlu1 %v335_v10, %s1600_s19 }
  0xab   : > { %951 = vrot.lane.b32.xlu0 %v335_v10, %s1604_s30 }
  0xae   : > { %949 = vrot.lane.b32.xlu1 %v326_v8, %s1604_s30 }
  0xaf   : > { %648 = vrot.lane.b32.xlu0 %v326_v8, %s1603_s29 }
  0xb2   : > { %650 = vrot.lane.b32.xlu1 %v335_v10, %s1603_s29 }
  0xb3   : > { %947 = vrot.lane.b32.xlu0 %v334_v6, %s1604_s30 }
  0xb6   : > { %1223 = vperm.xlu1 %1544, %v1220_v13  }
  0xfc   : > { %v761_v16 = vpop.permute.xlu1 %760  ;;  %v661_v17 = vpop.permute.xlu0 %660 }
 0x100   : > { %v377_v19 = vpop.permute.xlu1 %376 }
 0x101   : > { %v765_v21 = vpop.permute.xlu0 %764  ;;  %v384_v41 = vsel %vm380_vm10, 0.0, %v377_v19 }
 0x102   : > { %v385_v46 = vmul.f32 %v1433_v40, %v384_v41 }
 0x104   : > { %v763_v23 = vpop.permute.xlu1 %762 }
 0x105   : > { %v768_v24 = vsel %vm766_vm3, %v763_v23, %v765_v21  ;;  %v767_v25 = vsel %vm766_vm3, %v761_v16, %v763_v23  ;;  %v663_v27 = vpop.permute.xlu0 %662  ;;  %v1468_v21 = vld [vmem:[%s1802_s2 + $0x40] sm:$0x1f] }
 0x106   : > { %1453 = vmatprep.subr.msk.mxu0 %vm405_vm1, %v768_v24  ;;  %v667_v31 = vsel %vm666_vm6, %v661_v17, %v663_v27 }
 0x107   : > { %1454 = vmatpush1.msk.msra.mxu0 %vm405_vm1, %v767_v25  ;;  %v672_v36 = vmul.f32 %v1701_v30, %v667_v31 }
 0x108   : > { %v665_v29 = vpop.permute.xlu1 %664  ;;  %1455 = vmatmul.mubr.msk.f32.vlgmr.msra.gmra.mrb[0].mxu0 %vm401_vm2, %v1452_v26 }
 0x109   : > { %v668_v32 = vsel %vm666_vm6, %v663_v27, %v665_v29  ;;  %924 = vmatprep.mubr.f32.mxu0 %v1596_v4  ;;  %v1048_v35 = vpop.permute.xlu0 %1047 }
 0x10a   : > { %v671_v33 = vsel %vm391_vm7, %v668_v32, 0.0 }
 0x10b   : > { %v673_v34 = vmul.f32 %v1697_v28, %v671_v33 }
 0x10c   : > { %v934_v37 = vpop.permute.xlu1 %933 }
 0x10d   : > { %1457 = vmatprep.subr.msk.mxu0 %vm405_vm1, %v673_v34  ;;  %v379_v42 = vpop.permute.xlu0 %378 }
 0x10e   : > { %1458 = vmatpush1.msk.msra.mxu0 %vm405_vm1, %v672_v36  ;;  %v381_v43 = vsel %vm380_vm10, %v377_v19, %v379_v42  ;;  %v1448_v19 = vld [vmem:[%s1802_s2 + $0x18] sm:$0x1f] }
 0x10f   : > { %v386_v45 = vmul.f32 %v1712_v39, %v381_v43 }
 0x110   : > { %v388_v44 = vpop.permute.xlu1 %387  ;;  %1459 = vmatmul.mubr.msk.f32.vlgmr.msra.gmra.mrb[0].mxu0 %vm401_vm2, %v1456_v38 }
 0x111   : > { %1036 = vmatprep.mubr.f32.mxu0 %v1596_v4  ;;  %1441 = vmatprep.subr.msk.mxu1 %vm405_vm1, %v386_v45  ;;  %v936_v48 = vpop.permute.xlu0 %935 }
 0x112   : > { %v940_v49 = vsel %vm939_vm11, %v934_v37, %v936_v48  ;;  %1442 = vmatpush1.msk.msra.mxu1 %vm405_vm1, %v385_v46  ;;  %v1606_v37 = vmov 1966171168  }
 0x113   : > { %v944_v51 = vsel %vm380_vm10, 0.0, %v940_v49  ;;  %1443 = vmatmul.mubr.msk.f32.vlgmr.msra.gmra.mrb[0].mxu1 %vm401_vm2, %v398_v47  ;;  %v1247_v38 = vunpack.c.l.s4 %v1606_v37 }
 0x114   : > { %v938_v50 = vpop.permute.xlu1 %937  ;;  %636 = vmatprep.mubr.f32.mxu1 %v1596_v4  ;;  %v945_v54 = vmul.f32 %v1433_v40, %v944_v51 }
 0x115   : > { %v941_v52 = vsel %vm939_vm11, %v936_v48, %v938_v50  ;;  %v390_v55 = vpop.permute.xlu0 %389 }
 0x116   : > { %v946_v53 = vmul.f32 %v1712_v39, %v941_v52  ;;  %v392_v57 = vsel %vm391_vm7, %v388_v44, %v390_v55  ;;  %v395_v58 = vsel %vm391_vm7, %v390_v55, 0.0 }
 0x117   : > { %v396_v60 = vmul.f32 %v1701_v30, %v392_v57  ;;  %v397_v61 = vmul.f32 %v1697_v28, %v395_v58 }
 0x118   : > { %v647_v59 = vpop.permute.xlu1 %646  ;;  %1461 = vmatprep.subr.msk.mxu0 %vm405_vm1, %v946_v53 }
 0x119   : > { %1462 = vmatpush1.msk.msra.mxu0 %vm405_vm1, %v945_v54  ;;  %1445 = vmatprep.subr.msk.mxu1 %vm405_vm1, %v397_v61  ;;  %v1050_v63 = vpop.permute.xlu0 %1049 }
 0x11a   : > { %1463 = vmatmul.mubr.msk.f32.vlgmr.msra.gmra.mrb[0].mxu0 %vm401_vm2, %v1460_v56  ;;  %1446 = vmatpush1.msk.msra.mxu1 %vm405_vm1, %v396_v60  ;;  %v1054_v2 = vsel %vm1053_vm12, %v1048_v35, %v1050_v63 }
 0x11b   : > { %1127 = vmatprep.mubr.f32.mxu0 %v1596_v4  ;;  %1447 = vmatmul.mubr.msk.f32.vlgmr.msra.gmra.mrb[0].mxu1 %vm401_vm2, %v1444_v62 }
 0x11c   : > { %v1052_v0 = vpop.permute.xlu1 %1051  ;;  %749 = vmatprep.mubr.f32.mxu1 %v1596_v4 }
 0x11d   : > { %v1055_v1 = vsel %vm1053_vm12, %v1050_v63, %v1052_v0  ;;  %v952_v3 = vpop.permute.xlu0 %951 }
 0x11e   : > { %1465 = vmatprep.subr.msk.mxu0 %vm405_vm1, %v1055_v1 }
 0x11f   : > { %1466 = vmatpush1.msk.msra.mxu0 %vm405_vm1, %v1054_v2 }
 0x120   : > { %v950_v6 = vpop.permute.xlu1 %949 }
 0x121   : > { %v955_v7 = vsel %vm953_vm13, %v950_v6, %v952_v3  ;;  %v649_v10 = vpop.permute.xlu0 %648 }
 0x122   : > { %v958_v8 = vsel %vm391_vm7, %v955_v7, 0.0  ;;  %1467 = vmatmul.mubr.msk.f32.vlgmr.msra.gmra.mrb[0].mxu0 %vm401_vm2, %v1464_v5  ;;  %v653_v11 = vsel %vm652_vm14, %v647_v59, %v649_v10 }
 0x123   : > { %v960_v9 = vmul.f32 %v1697_v28, %v958_v8  ;;  %1211 = vmatprep.mubr.f32.mxu0 %v1596_v4  ;;  %v657_v13 = vsel %vm380_vm10, 0.0, %v653_v11 }
 0x124   : > { %v651_v12 = vpop.permute.xlu1 %650  ;;  %v658_v17 = vmul.f32 %v1433_v40, %v657_v13  ;;  %v1248_v40 = vunpack.c.0.s8 %v1247_v38 }
 0x125   : > { %v654_v15 = vsel %vm652_vm14, %v649_v10, %v651_v12  ;;  %1469 = vmatprep.subr.msk.mxu0 %vm405_vm1, %v960_v9  ;;  %v948_v18 = vpop.permute.xlu0 %947 }
 0x126   : > { %v659_v16 = vmul.f32 %v1712_v39, %v654_v15  ;;  %v954_v20 = vsel %vm953_vm13, %v948_v18, %v950_v6  ;;  %v1250_v39 = vshrl.u32 %v336_v14, 7 }
 0x127   : > { %v959_v4 = vmul.f32 %v1701_v30, %v954_v20 }
 0x128   : > { %1449 = vmatprep.subr.msk.mxu1 %vm405_vm1, %v659_v16  ;;  %v1251_v42 = vsub.s32 %v1248_v40, %v1250_v39 }
 0x129   : > { %1450 = vmatpush1.msk.msra.mxu1 %vm405_vm1, %v658_v17  ;;  %1470 = vmatpush1.msk.msra.mxu0 %vm405_vm1, %v959_v4 }
 0x12a   : > { %1451 = vmatmul.mubr.msk.f32.vlgmr.msra.gmra.mrb[0].mxu1 %vm401_vm2, %v1448_v19  ;;  %1471 = vmatmul.mubr.msk.f32.vlgmr.msra.gmra.mrb[0].mxu0 %vm401_vm2, %v1468_v21 }
 0x135   : > { %v1224_v25 = vpop.permute.xlu1 %1223 }
 0x1fd   : > { %v751_v22 = vpop.f32.mrb[0].mxu1  ;;  %v1213_v24 = vpop.f32.mrb[0].mxu0 }
 0x1fe   : > { %v753_v23 = vpop.f32.mrb[1].mxu1  ;;  %v1476_v26 = vadd.f32 %v1213_v24, %v751_v22  ;;  %v1215_v27 = vpop.f32.mrb[1].mxu0 }
 0x1ff   : > { %v1477_v28 = vadd.f32 %v1215_v27, %v753_v23 }
 0x200   : > { %v1226_v29 = vadd.f32 %v1476_v26, %v1224_v25 }
 0x201   : > { %v1227_v30 = vadd.f32 %v1477_v28, %v1224_v25 }
 0x202   : > { %v1472_v31 = vmul.f32 -1.442695, %v1226_v29 }
 0x203   : > { %v1473_v32 = vmul.f32 -1.442695, %v1227_v30 }
 0x204   : > { %1547 = vpow2.f32 %v1472_v31 }
 0x205   : > { %1549 = vpow2.f32 %v1473_v32 }
 0x20e   : > { %v1548_v33 = vpop.eup %1547 }
 0x20f   : > { %v1550_v34 = vpop.eup %1549  ;;  %v1234_v35 = vadd.f32 1.0, %v1548_v33 }
 0x210   : > { %v1235_v36 = vadd.f32 1.0, %v1550_v34 }
 0x211   : > { %1551 = vrcp.f32 %v1234_v35 }
 0x212   : > { %1553 = vrcp.f32 %v1235_v36 }
 0x21b   : > { %v1552_v41 = vpop.eup %1551 }
 0x21c   : > { %v1554_v43 = vpop.eup %1553 }
 0x21d   : > { %v1242_v44 = vcombine.low %v1552_v41, %v1554_v43  ;;  %v1245_v45 = vcombine.high %v1552_v41, %v1554_v43 }
 0x21f   : > { %1244 = vst [vmem:[%s306_s8] sm:$0xff] %v1242_v44  ;;  %v1252_v46 = vrot.slane %v1245_v45, %v1251_v42 }
 0x221   : > { %v1259_v47 = vrot.slane %v1252_v46, %v1251_v42 }
 0x223   : > { %1265 = vst.msk [vmem:[%s315_s11] sm:$0x3] %vm1263_vm15, %v1259_v47 }
 0x224 PF: > { %s16_s22 = sadd.s32 1, %s1593_s22   ;;  %s1806_s18 = smov %s1585_s20 }
 0x225   : > { %p13_p8 = scmp.ge.s32.totalorder %s16_s22, 10   ;;  %s1807_s19 = smov %s1589_s21 }
 0x226   : > { %s1808_s20 = smov %s1811_s23  ;;  %s1809_s21 = smov %s1815_s24 }
 0x227   :  { %15 = sbr.rel (!%p13_p8) target bundleno = 3 (0x3), region = 89 }

</bundles_post_ra>
